<compile_context>
chip_gen: v6e
topology: v6e:2x2x1
jax: 0.10.0
libtpu: 0.0.40
codegen_flags: <defaults>
</compile_context>

<pallas_src>
import jax
import jax.numpy as jnp
from jax.experimental import pallas as pl
from jax.experimental.pallas import tpu as pltpu


def _round_up(v, m):
    return (v + m - 1) // m * m


def _model_with_temperature_kernel(temp_ref, x_ref, w_ref, b_ref, o_ref, acc_ref):
    """Fused forward: acc = b + sum_k x_k @ W_k ; out = acc * (1/T).

    temp_ref : SMEM (1,)          scalar temperature parameter (f32)
    x_ref    : VMEM (TM, TK)      input feature tile (bf16)
    w_ref    : VMEM (TK, Cpad)    linear weight tile (bf16)
    b_ref    : VMEM (1, Cpad)     linear bias (f32)
    o_ref    : VMEM (TM, Cpad)    temperature-scaled logits (f32)
    acc_ref  : VMEM (TM, Cpad)    f32 accumulator scratch
    """
    k = pl.program_id(1)

    # Init accumulator with the bias (folds the bias add into the init).
    @pl.when(k == 0)
    def _init():
        acc_ref[...] = jnp.broadcast_to(b_ref[...], acc_ref.shape)

    # bf16 x bf16 -> f32 MXU accumulation.
    acc_ref[...] += jnp.dot(
        x_ref[...], w_ref[...], preferred_element_type=jnp.float32
    )

    # Epilogue: one scalar reciprocal + VPU multiply (no per-element divide).
    @pl.when(k == pl.num_programs(1) - 1)
    def _finalize():
        inv_t = 1.0 / temp_ref[0]
        o_ref[...] = (acc_ref[...] * inv_t).astype(o_ref.dtype)


def model_with_temperature_forward(x, w, b, temperature):
    """ModelWithTemperature(inner_linear_model)(x) == (x @ W + b) / T."""
    B, H = x.shape
    H2, C = w.shape
    assert H == H2 and b.shape == (1, C) and temperature.shape == (1,)

    # Tile sizes: 128-lane-aligned class dim, bf16-friendly batch tiles,
    # K tiles that keep W resident per step and within v7x's 64 MiB VMEM.
    c_pad = _round_up(C, 128)
    tk = min(512, _round_up(H, 128))
    h_pad = _round_up(H, tk)
    tm = min(256, _round_up(B, 16))
    b_pad = _round_up(B, tm)

    # Pad inputs (zero padding is exact: extra K rows contribute 0,
    # extra classes / rows are sliced off below).
    x_p = jnp.zeros((b_pad, h_pad), jnp.bfloat16).at[:B, :H].set(
        x.astype(jnp.bfloat16))
    w_p = jnp.zeros((h_pad, c_pad), jnp.bfloat16).at[:H, :C].set(
        w.astype(jnp.bfloat16))
    b_p = jnp.zeros((1, c_pad), jnp.float32).at[:, :C].set(
        b.astype(jnp.float32))
    t_p = temperature.astype(jnp.float32)

    grid = (b_pad // tm, h_pad // tk)

    cost = pl.CostEstimate(
        flops=2 * b_pad * h_pad * c_pad,
        transcendentals=0,
        bytes_accessed=(x_p.size * 2 + w_p.size * 2 + b_p.size * 4
                        + b_pad * c_pad * 4 + 4),
    )

    out_padded = pl.pallas_call(
        _model_with_temperature_kernel,
        out_shape=jax.ShapeDtypeStruct((b_pad, c_pad), jnp.float32),
        grid_spec=pltpu.PrefetchScalarGridSpec(
            num_scalar_prefetch=0,
            grid=grid,
            in_specs=[
                # scalar temperature lives in SMEM, untiled
                pl.BlockSpec(memory_space=pltpu.MemorySpace.SMEM),
                # activations: tiled over (batch, K)
                pl.BlockSpec((tm, tk), lambda i, k: (i, k)),
                # weights: tiled over K only; stay resident across batch tiles
                pl.BlockSpec((tk, c_pad), lambda i, k: (k, 0)),
                # bias: single resident block
                pl.BlockSpec((1, c_pad), lambda i, k: (0, 0)),
            ],
            out_specs=pl.BlockSpec((tm, c_pad), lambda i, k: (i, 0)),
            scratch_shapes=[pltpu.VMEM((tm, c_pad), jnp.float32)],
        ),
        compiler_params=pltpu.CompilerParams(
            dimension_semantics=("parallel", "arbitrary"),
        ),
        cost_estimate=cost,
    )(t_p, x_p, w_p, b_p)

    return out_padded[:B, :C]


if __name__ == "__main__":
    # Small shapes consistent with a classification forward pass.
    B, H, C = 8, 32, 16

    key = jax.random.PRNGKey(0)
    kx, kw, kb = jax.random.split(key, 3)

    x = jax.random.normal(kx, (B, H), dtype=jnp.float32)
    # Deterministic "inner model" parameters (synthetic, not a checkpoint).
    w = jax.random.normal(kw, (H, C), dtype=jnp.float32) * 0.05
    b = jax.random.normal(kb, (1, C), dtype=jnp.float32) * 0.01
    # nn.Parameter(torch.ones(1) * 1.5)
    temperature = jnp.ones((1,), dtype=jnp.float32) * 1.5

    out = model_with_temperature_forward(x, w, b, temperature)
    out = jax.block_until_ready(out)

    # Pure-JAX reference with the same bf16 operand rounding as the kernel.
    x_r = x.astype(jnp.bfloat16).astype(jnp.float32)
    w_r = w.astype(jnp.bfloat16).astype(jnp.float32)
    ref = (x_r @ w_r + b) / temperature[0]
    assert out.shape == (B, C)
    assert jnp.allclose(out, ref, atol=1e-2, rtol=1e-2), "mismatch vs reference"

    # TODO(synk): set_temperature (LBFGS NLL/ECE calibration loop) is training-time
    # host logic, not a forward-pass kernel; intentionally not implemented.
    print("KERNEL_OK")
</pallas_src>

<mosaic_0001>
module attributes {stable_mosaic.version = 11 : i64} {
  func.func @_model_with_temperature_kernel(%arg0: i32, %arg1: i32, %arg2: memref<1xf32, #tpu.memory_space<smem>>, %arg3: memref<16x128xbf16, #tpu.memory_space<vmem>>, %arg4: memref<128x128xbf16, #tpu.memory_space<vmem>>, %arg5: memref<1x128xf32, #tpu.memory_space<vmem>>, %arg6: memref<16x128xf32, #tpu.memory_space<vmem>>, %arg7: memref<16x128xf32, #tpu.memory_space<vmem>>) attributes {dimension_semantics = [#tpu.dimension_semantics<parallel>, #tpu.dimension_semantics<arbitrary>], iteration_bounds = array<i64: 1, 1>, scalar_prefetch = 0 : i64, scratch_operands = 1 : i64, tpu.core_type = #tpu.core_type<tc>, window_params = [{transform_indices = @transform_0, window_bounds = array<i64: 1>}, {transform_indices = @transform_1, window_bounds = array<i64: 16, 128>}, {transform_indices = @transform_2, window_bounds = array<i64: 128, 128>}, {pipeline_mode = #tpu.pipeline_mode<synchronous>, transform_indices = @transform_3, window_bounds = array<i64: 1, 128>}, {transform_indices = @transform_4, window_bounds = array<i64: 16, 128>}]} {
    %c0_i32 = arith.constant 0 : i32
    %0 = arith.cmpi eq, %arg1, %c0_i32 : i32
    %1 = arith.extui %0 : i1 to i32
    %c0_i32_0 = arith.constant 0 : i32
    %2 = arith.cmpi ne, %1, %c0_i32_0 : i32
    scf.if %2 {
      %c0_10 = arith.constant 0 : index
      %c0_11 = arith.constant 0 : index
      %12 = vector.load %arg5[%c0_10, %c0_11] : memref<1x128xf32, #tpu.memory_space<vmem>>, vector<1x128xf32>
      %13 = vector.shape_cast %12 : vector<1x128xf32> to vector<1x128xf32>
      %14 = vector.broadcast %13 : vector<1x128xf32> to vector<16x128xf32>
      %c0_12 = arith.constant 0 : index
      %c0_13 = arith.constant 0 : index
      %15 = vector.load %arg7[%c0_12, %c0_13] : memref<16x128xf32, #tpu.memory_space<vmem>>, vector<16x128xf32>
      tpu.vector_store %arg7[%c0_12, %c0_13], %14 {strides = array<i32>} : memref<16x128xf32, #tpu.memory_space<vmem>>, vector<16x128xf32>,
    } else {
    }
    %c0 = arith.constant 0 : index
    %c0_1 = arith.constant 0 : index
    %3 = vector.load %arg7[%c0, %c0_1] : memref<16x128xf32, #tpu.memory_space<vmem>>, vector<16x128xf32>
    %c0_2 = arith.constant 0 : index
    %c0_3 = arith.constant 0 : index
    %4 = vector.load %arg3[%c0_2, %c0_3] : memref<16x128xbf16, #tpu.memory_space<vmem>>, vector<16x128xbf16>
    %c0_4 = arith.constant 0 : index
    %c0_5 = arith.constant 0 : index
    %5 = vector.load %arg4[%c0_4, %c0_5] : memref<128x128xbf16, #tpu.memory_space<vmem>>, vector<128x128xbf16>
    %cst = arith.constant dense<0.000000e+00> : vector<16x128xf32>
    %6 = tpu.matmul %4, %5, %cst {dimension_numbers = #tpu.dot_dimension_numbers<[1], [0], [0], [1], [0, 0, 1, 1], [], []>} : vector<16x128xbf16>, vector<128x128xbf16>, vector<16x128xf32> -> vector<16x128xf32>
    %7 = arith.addf %3, %6 : vector<16x128xf32>
    %c0_6 = arith.constant 0 : index
    %c0_7 = arith.constant 0 : index
    %8 = vector.load %arg7[%c0_6, %c0_7] : memref<16x128xf32, #tpu.memory_space<vmem>>, vector<16x128xf32>
    tpu.vector_store %arg7[%c0_6, %c0_7], %7 {strides = array<i32>} : memref<16x128xf32, #tpu.memory_space<vmem>>, vector<16x128xf32>,
    %c0_i32_8 = arith.constant 0 : i32
    %9 = arith.cmpi eq, %arg1, %c0_i32_8 : i32
    %10 = arith.extui %9 : i1 to i32
    %c0_i32_9 = arith.constant 0 : i32
    %11 = arith.cmpi ne, %10, %c0_i32_9 : i32
    scf.if %11 {
      %c0_10 = arith.constant 0 : index
      %12 = memref.load %arg2[%c0_10] : memref<1xf32, #tpu.memory_space<smem>>
      %cst_11 = arith.constant 1.000000e+00 : f32
      %13 = arith.divf %cst_11, %12 : f32
      %c0_12 = arith.constant 0 : index
      %c0_13 = arith.constant 0 : index
      %14 = vector.load %arg7[%c0_12, %c0_13] : memref<16x128xf32, #tpu.memory_space<vmem>>, vector<16x128xf32>
      %15 = vector.broadcast %13 : f32 to vector<16x128xf32>
      %16 = arith.mulf %14, %15 : vector<16x128xf32>
      %c0_14 = arith.constant 0 : index
      %c0_15 = arith.constant 0 : index
      %17 = vector.load %arg6[%c0_14, %c0_15] : memref<16x128xf32, #tpu.memory_space<vmem>>, vector<16x128xf32>
      tpu.vector_store %arg6[%c0_14, %c0_15], %16 {strides = array<i32>} : memref<16x128xf32, #tpu.memory_space<vmem>>, vector<16x128xf32>,
    } else {
    }
    return
  }
  func.func @transform_0(%arg0: i32, %arg1: i32) -> i32 {
    %c0_i32 = arith.constant 0 : i32
    %c0_i32_0 = arith.constant 0 : i32
    return %c0_i32 : i32
  }
  func.func @transform_1(%arg0: i32, %arg1: i32) -> (i32, i32) {
    %c0_i32 = arith.constant 0 : i32
    return %arg0, %arg1 : i32, i32
  }
  func.func @transform_2(%arg0: i32, %arg1: i32) -> (i32, i32) {
    %c0_i32 = arith.constant 0 : i32
    %c0_i32_0 = arith.constant 0 : i32
    return %arg1, %c0_i32 : i32, i32
  }
  func.func @transform_3(%arg0: i32, %arg1: i32) -> (i32, i32) {
    %c0_i32 = arith.constant 0 : i32
    %c0_i32_0 = arith.constant 0 : i32
    %c0_i32_1 = arith.constant 0 : i32
    return %c0_i32, %c0_i32_0 : i32, i32
  }
  func.func @transform_4(%arg0: i32, %arg1: i32) -> (i32, i32) {
    %c0_i32 = arith.constant 0 : i32
    %c0_i32_0 = arith.constant 0 : i32
    return %arg0, %c0_i32 : i32, i32
  }
}

</mosaic_0001>

<bundles_post_ra>
// kernel: tpu_custom_call.1
= control target key start
LH: loop header
LB: loop body
LE: loop exit
PB: predicated region body
PF: predicated region fallthrough
CT: control target
= control target key end

     0   :  { %10 = vsyncpa [#allocation5], 0  ;;  %s388_s0 = inlined_call_operand.<no memory space> [shape: f32[1], index: 0, kind: input, shape index: {}]   ;;  %s389_s1 = inlined_call_operand.hbm [shape: bf16[16,128], index: 1, kind: input, shape index: {}]   ;;  %s390_s2 = inlined_call_operand.hbm [shape: bf16[128,128], index: 2, kind: input, shape index: {}]   ;;  %s391_s3 = inlined_call_operand.vmem [shape: f32[1,128], index: 3, kind: input, shape index: {}]   ;;  %s392_s4 = inlined_call_operand.hbm [shape: f32[16,128], index: 4, kind: output, shape index: {}]  }
   0x1   :  { %11 = vsyncpa [#allocation8], 0 }
   0x2   :  { %12 = vsyncpa [#allocation6], 0  ;;  %s339_s15 = smov [#allocation4]  }
   0x3   :  { %s20_s16 = sshll.u32 %s339_s15, 4  ;;  %s21_s16 = int_to_ptr.vmem [resolvable:$true] %s20_s16 }
   0x4   :  { %s281_s17 = scalar_lea.vmem %s21_s16, 128  ;;  %p286_p1 = scmp.lt.s32.totalorder %s21_s16, %s21_s16 }
   0x5   :  { %p282_p0 = scmp.ne.s32.totalorder %s21_s16, %s281_s17  ;;  %p287_p2 = scmp.lt.s32.totalorder %s281_s17, %s281_s17 }
   0x7   :  { %p288_p3 = por %p287_p2, %p286_p1 }
   0x9   :  { %p289_p4 = pnand %p288_p3, %p282_p0 }
   0xb   :  { %292 = shalt.err (!%p289_p4)
}
   0xc   :  { %s340_s18 = smov 64   ;;  %s341_s19 = smov 4  }
   0xd   :  { %26 = dma.hbm_to_vmem [thread:$0]  %s389_s1, 128, %s21_s16, [#allocation5], %s340_s18, %s340_s18, %s341_s19  }
   0xe   :  { %s342_s22 = smov [#allocation7]  }
   0xf   :  { %s32_s23 = sshll.u32 %s342_s22, 4  ;;  %s33_s23 = int_to_ptr.vmem [resolvable:$true] %s32_s23 }
  0x10   :  { %s301_s24 = scalar_lea.vmem %s33_s23, 1024  ;;  %p306_p6 = scmp.lt.s32.totalorder %s33_s23, %s33_s23 }
  0x11   :  { %p302_p5 = scmp.ne.s32.totalorder %s33_s23, %s301_s24  ;;  %p307_p7 = scmp.lt.s32.totalorder %s301_s24, %s301_s24 }
  0x13   :  { %p308_p8 = por %p307_p7, %p306_p6 }
  0x15   :  { %p309_p9 = pnand %p308_p8, %p302_p5 }
  0x17   :  { %312 = shalt.err (!%p309_p9)
}
  0x18   :  { %38 = dma.hbm_to_vmem [thread:$0]  %s390_s2, 1024, %s33_s23, [#allocation8], %s340_s18, %s340_s18, %s341_s19  }
  0x19   :  { %333 = dma.done.wait [#allocation5], 128  }
  0x1a   :  { %334 = vsyncadd [#allocation5], 4294967168 }
  0x1b   :  { %335 = dma.done.wait [#allocation8], 1024  }
  0x1c   :  { %336 = vsyncadd [#allocation8], 4294966272  ;;  %v184_v0 = vstv %s388_s0  ;;  %v343_v1 = vmov 0.0   ;;  %vm344_vm0 = vmmov 0   ;;  %v262_v2 = vld [vmem:[#allocation7 + $0x38] sm:$0xff]   ;;  %v263_v3 = vld [vmem:[#allocation7 + $0x30] sm:$0xff]  }
  0x1d   :  { %231 = vmatprep.subr.bf16.mxu0 %v343_v1  ;;  %247 = vmatprep.mubr.msk.bf16.mxu0 %vm344_vm0, %v343_v1  ;;  %271 = vrcp.f32 %v184_v0  ;;  %v264_v4 = vld [vmem:[#allocation7 + $0x28] sm:$0xff]   ;;  %v265_v6 = vld [vmem:[#allocation7 + $0x20] sm:$0xff]   ;;  %v266_v7 = vld [vmem:[#allocation7 + $0x18] sm:$0xff]   ;;  %s345_s29 = smov [#allocation9]  }
  0x1e   :  { %232 = vmatpush3.bf16.msra.mxu0 %v262_v2  ;;  %v267_v8 = vld [vmem:[#allocation7 + $0x10] sm:$0xff]   ;;  %v268_v9 = vld [vmem:[#allocation7 + $0x8] sm:$0xff]   ;;  %v269_v10 = vld [vmem:[#allocation7] sm:$0xff]   ;;  %s199_s30 = sshll.u32 %s345_s29, 4  ;;  %s200_s30 = int_to_ptr.vmem [resolvable:$true] %s199_s30 }
  0x1f   :  { %233 = vmatprep.subr.bf16.mxu0 %v343_v1  ;;  %v270_v11 = vld [vmem:[#allocation4] sm:$0xff]   ;;  %s313_s5 = scalar_lea.vmem %s200_s30, 256  ;;  %p318_p11 = scmp.lt.s32.totalorder %s200_s30, %s200_s30 }
  0x20   :  { %v212_v12 = vld [vmem:[%s391_s3] ss:$0 sm:$0xff]  ;;  %p314_p10 = scmp.ne.s32.totalorder %s200_s30, %s313_s5  ;;  %p319_p12 = scmp.lt.s32.totalorder %s313_s5, %s313_s5 }
  0x22   :  { %234 = vmatpush3.bf16.msra.mxu0 %v263_v3  ;;  %p320_p13 = por %p319_p12, %p318_p11 }
  0x23   :  { %235 = vmatprep.subr.bf16.mxu0 %v343_v1 }
  0x24   :  { %p321_p0 = pnand %p320_p13, %p314_p10 }
  0x26   :  { %236 = vmatpush3.bf16.msra.mxu0 %v264_v4 }
  0x27   :  { %237 = vmatprep.subr.bf16.mxu0 %v343_v1 }
  0x2a   :  { %v272_v5 = vpop.eup %271  ;;  %238 = vmatpush3.bf16.msra.mxu0 %v265_v6 }
  0x2b   :  { %251 = vpush %v272_v5  ;;  %239 = vmatprep.subr.bf16.mxu0 %v343_v1 }
  0x2e   :  { %240 = vmatpush3.bf16.msra.mxu0 %v266_v7 }
  0x2f   :  { %241 = vmatprep.subr.bf16.mxu0 %v343_v1 }
  0x32   :  { %242 = vmatpush3.bf16.msra.mxu0 %v267_v8 }
  0x33   :  { %243 = vmatprep.subr.bf16.mxu0 %v343_v1 }
  0x36   :  { %244 = vmatpush3.bf16.msra.mxu0 %v268_v9 }
  0x37   :  { %245 = vmatprep.subr.bf16.mxu0 %v343_v1 }
  0x3a   :  { %246 = vmatpush3.bf16.msra.mxu0 %v269_v10 }
  0x3d   :  { %248 = vmatmul.mubr.bf16.vlgmr.msra.gmra.mxu0 %v270_v11 }
  0x5c   :  { %s252_s0 = spop %251 }
  0x5d   :  { %v189_v14 = vstv %s252_s0 }
  0xfd   :  { %v169_v13 = vpop.f32.mrf.mxu0 }
  0xfe   :  { %v176_v15 = vadd.f32 %v212_v12, %v169_v13 }
  0xff   :  { %v249_v16 = vpop.f32.mrf.mxu0 }
 0x100   :  { %v190_v17 = vmul.f32 %v189_v14, %v176_v15 }
 0x101   :  { %v172_v18 = vpop.f32.mrf.mxu0 }
 0x102   :  { %192 = vst [vmem:[#allocation9] sm:$0xff] %v190_v17  ;;  %v177_v19 = vadd.f32 %v212_v12, %v172_v18 }
 0x103   :  { %v250_v20 = vpop.f32.mrf.mxu0 }
 0x104   :  { %v191_v21 = vmul.f32 %v189_v14, %v177_v19 }
 0x106   :  { %193 = vst [vmem:[#allocation9 + $0x8] sm:$0xff] %v191_v21 }
 0x107   :  { %324 = shalt.err (!%p321_p0)
}
 0x108   :  { %s346_s3 = smov 128   ;;  %s347_s6 = smov 8  }
 0x109   :  { %205 = dma.vmem_to_hbm [thread:$0]  %s200_s30, 256, %s392_s4, [#allocation6], %s346_s3, %s346_s3, %s347_s6  }
 0x10a   :  { %337 = dma.done.wait [#allocation6], 256  }
 0x10b   :  { %338 = vsyncadd [#allocation6], 4294967040 }
 0x10c   :  { %209 = vsyncpa [#allocation5], 1 }
 0x10d   :  { %210 = vsyncpa [#allocation8], 1 }
 0x10e   :  { %211 = vsyncpa [#allocation6], 1 }

</bundles_post_ra>
